<compile_context>
chip_gen: v5e
topology: v5e:2x2
jax: 0.10.0
libtpu: 0.0.40
codegen_flags: <defaults>
</compile_context>

<pallas_src>
import numpy as np
import jax
import jax.numpy as jnp
from jax import lax
from jax.experimental import pallas as pl
from jax.experimental.pallas import tpu as pltpu

TIME_KEY = "time"
XIC_KEY = "xic"

_B = 8  # samples per grid step; 2*_B*C rows per output block is always 8-aligned


def inside_time_window(time_points, t):
    return bool(time_points[0] - 1 < t) and bool(t < time_points[-1] + 1)


@jax.jit
def _peak_quality_window(xic, sel, bidx):
    """xic: (N, C, T, P) f32; sel, bidx: (N, 2) i32 -> (N, C, 2, P) f32.

    Returns the two selected transition rows per sample, zeroed outside the
    [b0, b1) window."""
    N, C, T, P = xic.shape
    B = _B
    N_pad = pl.cdiv(N, B) * B
    P_pad = pl.cdiv(P, 128) * 128

    # Wrapper-side layout prep (one XLA pass, outside the kernel):
    #  - move the gathered transition axis out of the minor two dims,
    #  - pad the lane axis to a multiple of 128 so all loads/stores are dense.
    xic_t = jnp.swapaxes(xic, 1, 2)                       # (N, T, C, P)
    if P_pad != P:
        xic_t = jnp.pad(xic_t, ((0, 0), (0, 0), (0, 0), (0, P_pad - P)))

    # 1-D int32 scalar-prefetch arrays (SMEM-friendly; no [N,2] row padding).
    sel_flat = jnp.pad(sel.astype(jnp.int32),
                       ((0, N_pad - N), (0, 0))).reshape(-1)
    bidx_flat = jnp.pad(bidx.astype(jnp.int32),
                        ((0, N_pad - N), (0, 0))).reshape(-1)
    # Padded slots read sample N-1 (valid memory); their (0, 0) window zeroes
    # the result, which is sliced off below.
    samp = jnp.minimum(jnp.arange(N_pad, dtype=jnp.int32), N - 1)

    def kernel(samp_ref, sel_ref, bidx_ref, *refs):
        # refs = 2*B gathered input tiles of shape (C, P_pad) + the output ref.
        out_ref = refs[-1]
        x_refs = refs[:-1]
        i = pl.program_id(0)
        lane = lax.broadcasted_iota(jnp.int32, (1, P_pad), 1)   # hoisted once
        pieces = []
        for b in range(B):                                      # static unroll
            flat = i * B + b
            b0 = bidx_ref[2 * flat]
            b1 = bidx_ref[2 * flat + 1]
            win = jnp.logical_and(lane >= b0, lane < b1)        # (1, P_pad)
            rows = jnp.concatenate(
                [x_refs[2 * b][...], x_refs[2 * b + 1][...]], axis=0)  # (2C, P)
            pieces.append(jnp.where(win, rows, 0.0))
        # Single fused, sublane/lane-dense store of the whole step slab.
        out_ref[...] = jnp.concatenate(pieces, axis=0)          # (2*B*C, P_pad)

    def make_in_spec(b, t):
        def imap(i, samp_ref, sel_ref, bidx_ref):
            flat = i * B + b
            return (samp_ref[flat], sel_ref[2 * flat + t], 0, 0)
        # (None, None, C, P_pad): sample & transition dims squeezed; the minor
        # two dims are full array dims, satisfying the (8, 128) block rule.
        return pl.BlockSpec((None, None, C, P_pad), imap)

    in_specs = [make_in_spec(b, t) for b in range(B) for t in range(2)]

    grid_spec = pltpu.PrefetchScalarGridSpec(
        num_scalar_prefetch=3,
        grid=(N_pad // B,),
        in_specs=in_specs,
        out_specs=pl.BlockSpec((2 * B * C, P_pad), lambda i, *_: (i, 0)),
    )

    out_flat = pl.pallas_call(
        kernel,
        out_shape=jax.ShapeDtypeStruct((N_pad * 2 * C, P_pad), jnp.float32),
        grid_spec=grid_spec,
        compiler_params=pltpu.CompilerParams(
            dimension_semantics=("parallel",)),
    )(samp, sel_flat, bidx_flat, *([xic_t] * (2 * B)))

    # Layout plumbing back to the reference ordering (C, 2, P) per sample.
    out = out_flat.reshape(N_pad, 2, C, P_pad)[:N, :, :, :P]
    return jnp.swapaxes(out, 1, 2)                              # (N, C, 2, P)


def make_peak_quality_target_batch(samples, rng_key):
    """Batched Pallas-backed equivalent of MakePeakQualityTarget.forward.

    All samples must share the same xic shape (C, T, P)."""
    N = len(samples)
    # Demo driver stacking; in a real pipeline pre-stack device arrays outside
    # the timed region.
    xic = jnp.stack([jnp.asarray(s[XIC_KEY], jnp.float32) for s in samples])
    mpq = jnp.stack([jnp.asarray(s["manual_peak_quality"], jnp.int32)
                     for s in samples])
    _, C, T, P = xic.shape

    # Host-side scalar work: time-window check + np.interp boundary indices in
    # float64, matching the numpy reference exactly (the data-dependent
    # ValueError cannot be raised from inside a traced kernel).
    bidx_np = np.empty((N, 2), dtype=np.int32)
    for n, s in enumerate(samples):
        tp = np.asarray(s[TIME_KEY], dtype=np.float64)
        st, et = float(s["start_time"]), float(s["end_time"])
        if not inside_time_window(tp, st) or not inside_time_window(tp, et):
            raise ValueError(
                f"start_time({st}) or end_time({et}) is outside of "
                f"time_points [{tp[0]}-{tp[-1]}]")
        bidx_np[n] = np.interp(np.array([st, et]), tp, np.arange(tp.shape[0])
                               ).astype(np.int32).clip(min=0, max=tp.shape[0])
    bidx = jnp.asarray(bidx_np)

    # np.random.permutation(...)[:2] -> deterministic per-sample jax.random,
    # vmapped over keys (not bit-identical to numpy's global RNG stream).
    keys = jax.random.split(rng_key, N)
    sel = jax.vmap(lambda k: jax.random.permutation(k, T)[:2])(keys
                   ).astype(jnp.int32)

    # Label is a handful of scalar ops; keep it in plain JAX outside the kernel.
    labels = (jnp.take_along_axis(mpq, sel, axis=1).sum(axis=1) == 2
              ).astype(jnp.int32)

    xic_win = _peak_quality_window(xic, sel, bidx)              # (N, C, 2, P)

    outs = []
    for n, s in enumerate(samples):
        out = dict(s)
        # TODO(synk): the reference returns the dynamic-length slice
        # xic[:, sel, b0:b1]; traced output shapes must be static, so we emit
        # the full-length window zero-masked outside [b0, b1) plus the boundary
        # indices instead.
        out[XIC_KEY] = xic_win[n]
        out["xic_boundary_idx"] = bidx[n]
        out["manual_quality"] = labels[n]
        out["selected_transitions"] = sel[n]
        outs.append(out)
    return outs


def make_peak_quality_target(sample, rng_key):
    """Single-sample Pallas-backed equivalent of MakePeakQualityTarget.forward."""
    return make_peak_quality_target_batch([sample], rng_key)[0]


if __name__ == "__main__":
    key = jax.random.PRNGKey(0)
    k_sel, k_data = jax.random.split(key)

    # samples, ion channels, transitions, time points (P deliberately not a
    # multiple of 128 to exercise the lane-padding path; N > _B exercises the
    # multi-step grid and the padded-slot path).
    N, C, T, P = 10, 4, 6, 120
    sample_keys = jax.random.split(k_data, N)
    samples = []
    for n in range(N):
        k_xic, k_q = jax.random.split(sample_keys[n])
        time_points = np.linspace(10.0 + n, 20.0 + n, P).astype(np.float32)
        samples.append({
            TIME_KEY: time_points,
            "start_time": 12.3 + n,
            "end_time": 15.7 + n,
            XIC_KEY: jax.random.uniform(k_xic, (C, T, P), dtype=jnp.float32),
            "manual_peak_quality":
                jax.random.bernoulli(k_q, 0.7, (T,)).astype(jnp.int32),
        })

    outs = make_peak_quality_target_batch(samples, k_sel)
    jax.block_until_ready([(o[XIC_KEY], o["xic_boundary_idx"], o["manual_quality"])
                           for o in outs])

    # --- numpy reference check (same selected transitions) ---
    for s, o in zip(samples, outs):
        tp = np.asarray(s[TIME_KEY], dtype=np.float64)
        sel_np = np.asarray(o["selected_transitions"])
        got_bidx = np.asarray(o["xic_boundary_idx"])
        ref_bidx = np.interp(np.array([s["start_time"], s["end_time"]]), tp,
                             np.arange(P)).astype(np.int32).clip(min=0, max=P)
        assert np.array_equal(got_bidx, ref_bidx), (got_bidx, ref_bidx)

        b0, b1 = int(ref_bidx[0]), int(ref_bidx[1])
        xic_np = np.asarray(s[XIC_KEY])
        lane = np.arange(P)
        ref_win = np.where((lane >= b0) & (lane < b1),
                           xic_np[:, sel_np, :], 0.0)
        assert np.allclose(np.asarray(o[XIC_KEY]), ref_win, atol=1e-6), \
            "window mismatch"

        ref_label = 1 if int(np.asarray(s["manual_peak_quality"])[sel_np].sum()) == 2 else 0
        assert int(o["manual_quality"]) == ref_label

    print("KERNEL_OK")
</pallas_src>

<mosaic_0001>
module attributes {stable_mosaic.version = 11 : i64} {
  func.func @kernel(%arg0: i32, %arg1: memref<16xi32, #tpu.memory_space<smem>>, %arg2: memref<32xi32, #tpu.memory_space<smem>>, %arg3: memref<32xi32, #tpu.memory_space<smem>>, %arg4: memref<1x1x4x128xf32, #tpu.memory_space<vmem>>, %arg5: memref<1x1x4x128xf32, #tpu.memory_space<vmem>>, %arg6: memref<1x1x4x128xf32, #tpu.memory_space<vmem>>, %arg7: memref<1x1x4x128xf32, #tpu.memory_space<vmem>>, %arg8: memref<1x1x4x128xf32, #tpu.memory_space<vmem>>, %arg9: memref<1x1x4x128xf32, #tpu.memory_space<vmem>>, %arg10: memref<1x1x4x128xf32, #tpu.memory_space<vmem>>, %arg11: memref<1x1x4x128xf32, #tpu.memory_space<vmem>>, %arg12: memref<1x1x4x128xf32, #tpu.memory_space<vmem>>, %arg13: memref<1x1x4x128xf32, #tpu.memory_space<vmem>>, %arg14: memref<1x1x4x128xf32, #tpu.memory_space<vmem>>, %arg15: memref<1x1x4x128xf32, #tpu.memory_space<vmem>>, %arg16: memref<1x1x4x128xf32, #tpu.memory_space<vmem>>, %arg17: memref<1x1x4x128xf32, #tpu.memory_space<vmem>>, %arg18: memref<1x1x4x128xf32, #tpu.memory_space<vmem>>, %arg19: memref<1x1x4x128xf32, #tpu.memory_space<vmem>>, %arg20: memref<64x128xf32, #tpu.memory_space<vmem>>) attributes {dimension_semantics = [#tpu.dimension_semantics<parallel>], iteration_bounds = array<i64: 2>, scalar_prefetch = 3 : i64, scratch_operands = 0 : i64, tpu.core_type = #tpu.core_type<tc>, window_params = [{transform_indices = @transform_0, window_bounds = array<i64: 1, 1, 4, 128>}, {transform_indices = @transform_1, window_bounds = array<i64: 1, 1, 4, 128>}, {transform_indices = @transform_2, window_bounds = array<i64: 1, 1, 4, 128>}, {transform_indices = @transform_3, window_bounds = array<i64: 1, 1, 4, 128>}, {transform_indices = @transform_4, window_bounds = array<i64: 1, 1, 4, 128>}, {transform_indices = @transform_5, window_bounds = array<i64: 1, 1, 4, 128>}, {transform_indices = @transform_6, window_bounds = array<i64: 1, 1, 4, 128>}, {transform_indices = @transform_7, window_bounds = array<i64: 1, 1, 4, 128>}, {transform_indices = @transform_8, window_bounds = array<i64: 1, 1, 4, 128>}, {transform_indices = @transform_9, window_bounds = array<i64: 1, 1, 4, 128>}, {transform_indices = @transform_10, window_bounds = array<i64: 1, 1, 4, 128>}, {transform_indices = @transform_11, window_bounds = array<i64: 1, 1, 4, 128>}, {transform_indices = @transform_12, window_bounds = array<i64: 1, 1, 4, 128>}, {transform_indices = @transform_13, window_bounds = array<i64: 1, 1, 4, 128>}, {transform_indices = @transform_14, window_bounds = array<i64: 1, 1, 4, 128>}, {transform_indices = @transform_15, window_bounds = array<i64: 1, 1, 4, 128>}, {transform_indices = @transform_16, window_bounds = array<i64: 64, 128>}]} {
    %0 = tpu.iota {dimensions = array<i32: 1>} : vector<1x128xi32>
    %c8_i32 = arith.constant 8 : i32
    %1 = arith.muli %arg0, %c8_i32 : i32
    %c0_i32 = arith.constant 0 : i32
    %2 = arith.addi %1, %c0_i32 : i32
    %c2_i32 = arith.constant 2 : i32
    %3 = arith.muli %c2_i32, %2 : i32
    %4 = arith.index_cast %3 : i32 to index
    %5 = memref.load %arg3[%4] : memref<32xi32, #tpu.memory_space<smem>>
    %c2_i32_0 = arith.constant 2 : i32
    %6 = arith.muli %c2_i32_0, %2 : i32
    %c1_i32 = arith.constant 1 : i32
    %7 = arith.addi %6, %c1_i32 : i32
    %8 = arith.index_cast %7 : i32 to index
    %9 = memref.load %arg3[%8] : memref<32xi32, #tpu.memory_space<smem>>
    %10 = vector.broadcast %5 : i32 to vector<1x128xi32>
    %11 = arith.cmpi sge, %0, %10 : vector<1x128xi32>
    %12 = vector.broadcast %9 : i32 to vector<1x128xi32>
    %13 = arith.cmpi slt, %0, %12 : vector<1x128xi32>
    %14 = arith.andi %11, %13 : vector<1x128xi1>
    %c0 = arith.constant 0 : index
    %c0_1 = arith.constant 0 : index
    %c0_2 = arith.constant 0 : index
    %c0_3 = arith.constant 0 : index
    %15 = vector.load %arg4[%c0, %c0_1, %c0_2, %c0_3] : memref<1x1x4x128xf32, #tpu.memory_space<vmem>>, vector<1x1x4x128xf32>
    %16 = vector.shape_cast %15 : vector<1x1x4x128xf32> to vector<4x128xf32>
    %c0_4 = arith.constant 0 : index
    %c0_5 = arith.constant 0 : index
    %c0_6 = arith.constant 0 : index
    %c0_7 = arith.constant 0 : index
    %17 = vector.load %arg5[%c0_4, %c0_5, %c0_6, %c0_7] : memref<1x1x4x128xf32, #tpu.memory_space<vmem>>, vector<1x1x4x128xf32>
    %18 = vector.shape_cast %17 : vector<1x1x4x128xf32> to vector<4x128xf32>
    %19 = tpu.concatenate %16, %18 in 0 : vector<4x128xf32>, vector<4x128xf32> -> vector<8x128xf32>
    %cst = arith.constant 0.000000e+00 : f32
    %20 = vector.shape_cast %14 : vector<1x128xi1> to vector<1x128xi1>
    %21 = vector.broadcast %20 : vector<1x128xi1> to vector<8x128xi1>
    %22 = vector.broadcast %cst : f32 to vector<8x128xf32>
    %23 = arith.select %21, %19, %22 : vector<8x128xi1>, vector<8x128xf32>
    %c8_i32_8 = arith.constant 8 : i32
    %24 = arith.muli %arg0, %c8_i32_8 : i32
    %c1_i32_9 = arith.constant 1 : i32
    %25 = arith.addi %24, %c1_i32_9 : i32
    %c2_i32_10 = arith.constant 2 : i32
    %26 = arith.muli %c2_i32_10, %25 : i32
    %27 = arith.index_cast %26 : i32 to index
    %28 = memref.load %arg3[%27] : memref<32xi32, #tpu.memory_space<smem>>
    %c2_i32_11 = arith.constant 2 : i32
    %29 = arith.muli %c2_i32_11, %25 : i32
    %c1_i32_12 = arith.constant 1 : i32
    %30 = arith.addi %29, %c1_i32_12 : i32
    %31 = arith.index_cast %30 : i32 to index
    %32 = memref.load %arg3[%31] : memref<32xi32, #tpu.memory_space<smem>>
    %33 = vector.broadcast %28 : i32 to vector<1x128xi32>
    %34 = arith.cmpi sge, %0, %33 : vector<1x128xi32>
    %35 = vector.broadcast %32 : i32 to vector<1x128xi32>
    %36 = arith.cmpi slt, %0, %35 : vector<1x128xi32>
    %37 = arith.andi %34, %36 : vector<1x128xi1>
    %c0_13 = arith.constant 0 : index
    %c0_14 = arith.constant 0 : index
    %c0_15 = arith.constant 0 : index
    %c0_16 = arith.constant 0 : index
    %38 = vector.load %arg6[%c0_13, %c0_14, %c0_15, %c0_16] : memref<1x1x4x128xf32, #tpu.memory_space<vmem>>, vector<1x1x4x128xf32>
    %39 = vector.shape_cast %38 : vector<1x1x4x128xf32> to vector<4x128xf32>
    %c0_17 = arith.constant 0 : index
    %c0_18 = arith.constant 0 : index
    %c0_19 = arith.constant 0 : index
    %c0_20 = arith.constant 0 : index
    %40 = vector.load %arg7[%c0_17, %c0_18, %c0_19, %c0_20] : memref<1x1x4x128xf32, #tpu.memory_space<vmem>>, vector<1x1x4x128xf32>
    %41 = vector.shape_cast %40 : vector<1x1x4x128xf32> to vector<4x128xf32>
    %42 = tpu.concatenate %39, %41 in 0 : vector<4x128xf32>, vector<4x128xf32> -> vector<8x128xf32>
    %cst_21 = arith.constant 0.000000e+00 : f32
    %43 = vector.shape_cast %37 : vector<1x128xi1> to vector<1x128xi1>
    %44 = vector.broadcast %43 : vector<1x128xi1> to vector<8x128xi1>
    %45 = vector.broadcast %cst_21 : f32 to vector<8x128xf32>
    %46 = arith.select %44, %42, %45 : vector<8x128xi1>, vector<8x128xf32>
    %c8_i32_22 = arith.constant 8 : i32
    %47 = arith.muli %arg0, %c8_i32_22 : i32
    %c2_i32_23 = arith.constant 2 : i32
    %48 = arith.addi %47, %c2_i32_23 : i32
    %c2_i32_24 = arith.constant 2 : i32
    %49 = arith.muli %c2_i32_24, %48 : i32
    %50 = arith.index_cast %49 : i32 to index
    %51 = memref.load %arg3[%50] : memref<32xi32, #tpu.memory_space<smem>>
    %c2_i32_25 = arith.constant 2 : i32
    %52 = arith.muli %c2_i32_25, %48 : i32
    %c1_i32_26 = arith.constant 1 : i32
    %53 = arith.addi %52, %c1_i32_26 : i32
    %54 = arith.index_cast %53 : i32 to index
    %55 = memref.load %arg3[%54] : memref<32xi32, #tpu.memory_space<smem>>
    %56 = vector.broadcast %51 : i32 to vector<1x128xi32>
    %57 = arith.cmpi sge, %0, %56 : vector<1x128xi32>
    %58 = vector.broadcast %55 : i32 to vector<1x128xi32>
    %59 = arith.cmpi slt, %0, %58 : vector<1x128xi32>
    %60 = arith.andi %57, %59 : vector<1x128xi1>
    %c0_27 = arith.constant 0 : index
    %c0_28 = arith.constant 0 : index
    %c0_29 = arith.constant 0 : index
    %c0_30 = arith.constant 0 : index
    %61 = vector.load %arg8[%c0_27, %c0_28, %c0_29, %c0_30] : memref<1x1x4x128xf32, #tpu.memory_space<vmem>>, vector<1x1x4x128xf32>
    %62 = vector.shape_cast %61 : vector<1x1x4x128xf32> to vector<4x128xf32>
    %c0_31 = arith.constant 0 : index
    %c0_32 = arith.constant 0 : index
    %c0_33 = arith.constant 0 : index
    %c0_34 = arith.constant 0 : index
    %63 = vector.load %arg9[%c0_31, %c0_32, %c0_33, %c0_34] : memref<1x1x4x128xf32, #tpu.memory_space<vmem>>, vector<1x1x4x128xf32>
    %64 = vector.shape_cast %63 : vector<1x1x4x128xf32> to vector<4x128xf32>
    %65 = tpu.concatenate %62, %64 in 0 : vector<4x128xf32>, vector<4x128xf32> -> vector<8x128xf32>
    %cst_35 = arith.constant 0.000000e+00 : f32
    %66 = vector.shape_cast %60 : vector<1x128xi1> to vector<1x128xi1>
    %67 = vector.broadcast %66 : vector<1x128xi1> to vector<8x128xi1>
    %68 = vector.broadcast %cst_35 : f32 to vector<8x128xf32>
    %69 = arith.select %67, %65, %68 : vector<8x128xi1>, vector<8x128xf32>
    %c8_i32_36 = arith.constant 8 : i32
    %70 = arith.muli %arg0, %c8_i32_36 : i32
    %c3_i32 = arith.constant 3 : i32
    %71 = arith.addi %70, %c3_i32 : i32
    %c2_i32_37 = arith.constant 2 : i32
    %72 = arith.muli %c2_i32_37, %71 : i32
    %73 = arith.index_cast %72 : i32 to index
    %74 = memref.load %arg3[%73] : memref<32xi32, #tpu.memory_space<smem>>
    %c2_i32_38 = arith.constant 2 : i32
    %75 = arith.muli %c2_i32_38, %71 : i32
    %c1_i32_39 = arith.constant 1 : i32
    %76 = arith.addi %75, %c1_i32_39 : i32
    %77 = arith.index_cast %76 : i32 to index
    %78 = memref.load %arg3[%77] : memref<32xi32, #tpu.memory_space<smem>>
    %79 = vector.broadcast %74 : i32 to vector<1x128xi32>
    %80 = arith.cmpi sge, %0, %79 : vector<1x128xi32>
    %81 = vector.broadcast %78 : i32 to vector<1x128xi32>
    %82 = arith.cmpi slt, %0, %81 : vector<1x128xi32>
    %83 = arith.andi %80, %82 : vector<1x128xi1>
    %c0_40 = arith.constant 0 : index
    %c0_41 = arith.constant 0 : index
    %c0_42 = arith.constant 0 : index
    %c0_43 = arith.constant 0 : index
    %84 = vector.load %arg10[%c0_40, %c0_41, %c0_42, %c0_43] : memref<1x1x4x128xf32, #tpu.memory_space<vmem>>, vector<1x1x4x128xf32>
    %85 = vector.shape_cast %84 : vector<1x1x4x128xf32> to vector<4x128xf32>
    %c0_44 = arith.constant 0 : index
    %c0_45 = arith.constant 0 : index
    %c0_46 = arith.constant 0 : index
    %c0_47 = arith.constant 0 : index
    %86 = vector.load %arg11[%c0_44, %c0_45, %c0_46, %c0_47] : memref<1x1x4x128xf32, #tpu.memory_space<vmem>>, vector<1x1x4x128xf32>
    %87 = vector.shape_cast %86 : vector<1x1x4x128xf32> to vector<4x128xf32>
    %88 = tpu.concatenate %85, %87 in 0 : vector<4x128xf32>, vector<4x128xf32> -> vector<8x128xf32>
    %cst_48 = arith.constant 0.000000e+00 : f32
    %89 = vector.shape_cast %83 : vector<1x128xi1> to vector<1x128xi1>
    %90 = vector.broadcast %89 : vector<1x128xi1> to vector<8x128xi1>
    %91 = vector.broadcast %cst_48 : f32 to vector<8x128xf32>
    %92 = arith.select %90, %88, %91 : vector<8x128xi1>, vector<8x128xf32>
    %c8_i32_49 = arith.constant 8 : i32
    %93 = arith.muli %arg0, %c8_i32_49 : i32
    %c4_i32 = arith.constant 4 : i32
    %94 = arith.addi %93, %c4_i32 : i32
    %c2_i32_50 = arith.constant 2 : i32
    %95 = arith.muli %c2_i32_50, %94 : i32
    %96 = arith.index_cast %95 : i32 to index
    %97 = memref.load %arg3[%96] : memref<32xi32, #tpu.memory_space<smem>>
    %c2_i32_51 = arith.constant 2 : i32
    %98 = arith.muli %c2_i32_51, %94 : i32
    %c1_i32_52 = arith.constant 1 : i32
    %99 = arith.addi %98, %c1_i32_52 : i32
    %100 = arith.index_cast %99 : i32 to index
    %101 = memref.load %arg3[%100] : memref<32xi32, #tpu.memory_space<smem>>
    %102 = vector.broadcast %97 : i32 to vector<1x128xi32>
    %103 = arith.cmpi sge, %0, %102 : vector<1x128xi32>
    %104 = vector.broadcast %101 : i32 to vector<1x128xi32>
    %105 = arith.cmpi slt, %0, %104 : vector<1x128xi32>
    %106 = arith.andi %103, %105 : vector<1x128xi1>
    %c0_53 = arith.constant 0 : index
    %c0_54 = arith.constant 0 : index
    %c0_55 = arith.constant 0 : index
    %c0_56 = arith.constant 0 : index
    %107 = vector.load %arg12[%c0_53, %c0_54, %c0_55, %c0_56] : memref<1x1x4x128xf32, #tpu.memory_space<vmem>>, vector<1x1x4x128xf32>
    %108 = vector.shape_cast %107 : vector<1x1x4x128xf32> to vector<4x128xf32>
    %c0_57 = arith.constant 0 : index
    %c0_58 = arith.constant 0 : index
    %c0_59 = arith.constant 0 : index
    %c0_60 = arith.constant 0 : index
    %109 = vector.load %arg13[%c0_57, %c0_58, %c0_59, %c0_60] : memref<1x1x4x128xf32, #tpu.memory_space<vmem>>, vector<1x1x4x128xf32>
    %110 = vector.shape_cast %109 : vector<1x1x4x128xf32> to vector<4x128xf32>
    %111 = tpu.concatenate %108, %110 in 0 : vector<4x128xf32>, vector<4x128xf32> -> vector<8x128xf32>
    %cst_61 = arith.constant 0.000000e+00 : f32
    %112 = vector.shape_cast %106 : vector<1x128xi1> to vector<1x128xi1>
    %113 = vector.broadcast %112 : vector<1x128xi1> to vector<8x128xi1>
    %114 = vector.broadcast %cst_61 : f32 to vector<8x128xf32>
    %115 = arith.select %113, %111, %114 : vector<8x128xi1>, vector<8x128xf32>
    %c8_i32_62 = arith.constant 8 : i32
    %116 = arith.muli %arg0, %c8_i32_62 : i32
    %c5_i32 = arith.constant 5 : i32
    %117 = arith.addi %116, %c5_i32 : i32
    %c2_i32_63 = arith.constant 2 : i32
    %118 = arith.muli %c2_i32_63, %117 : i32
    %119 = arith.index_cast %118 : i32 to index
    %120 = memref.load %arg3[%119] : memref<32xi32, #tpu.memory_space<smem>>
    %c2_i32_64 = arith.constant 2 : i32
    %121 = arith.muli %c2_i32_64, %117 : i32
    %c1_i32_65 = arith.constant 1 : i32
    %122 = arith.addi %121, %c1_i32_65 : i32
    %123 = arith.index_cast %122 : i32 to index
    %124 = memref.load %arg3[%123] : memref<32xi32, #tpu.memory_space<smem>>
    %125 = vector.broadcast %120 : i32 to vector<1x128xi32>
    %126 = arith.cmpi sge, %0, %125 : vector<1x128xi32>
    %127 = vector.broadcast %124 : i32 to vector<1x128xi32>
    %128 = arith.cmpi slt, %0, %127 : vector<1x128xi32>
    %129 = arith.andi %126, %128 : vector<1x128xi1>
    %c0_66 = arith.constant 0 : index
    %c0_67 = arith.constant 0 : index
    %c0_68 = arith.constant 0 : index
    %c0_69 = arith.constant 0 : index
    %130 = vector.load %arg14[%c0_66, %c0_67, %c0_68, %c0_69] : memref<1x1x4x128xf32, #tpu.memory_space<vmem>>, vector<1x1x4x128xf32>
    %131 = vector.shape_cast %130 : vector<1x1x4x128xf32> to vector<4x128xf32>
    %c0_70 = arith.constant 0 : index
    %c0_71 = arith.constant 0 : index
    %c0_72 = arith.constant 0 : index
    %c0_73 = arith.constant 0 : index
    %132 = vector.load %arg15[%c0_70, %c0_71, %c0_72, %c0_73] : memref<1x1x4x128xf32, #tpu.memory_space<vmem>>, vector<1x1x4x128xf32>
    %133 = vector.shape_cast %132 : vector<1x1x4x128xf32> to vector<4x128xf32>
    %134 = tpu.concatenate %131, %133 in 0 : vector<4x128xf32>, vector<4x128xf32> -> vector<8x128xf32>
    %cst_74 = arith.constant 0.000000e+00 : f32
    %135 = vector.shape_cast %129 : vector<1x128xi1> to vector<1x128xi1>
    %136 = vector.broadcast %135 : vector<1x128xi1> to vector<8x128xi1>
    %137 = vector.broadcast %cst_74 : f32 to vector<8x128xf32>
    %138 = arith.select %136, %134, %137 : vector<8x128xi1>, vector<8x128xf32>
    %c8_i32_75 = arith.constant 8 : i32
    %139 = arith.muli %arg0, %c8_i32_75 : i32
    %c6_i32 = arith.constant 6 : i32
    %140 = arith.addi %139, %c6_i32 : i32
    %c2_i32_76 = arith.constant 2 : i32
    %141 = arith.muli %c2_i32_76, %140 : i32
    %142 = arith.index_cast %141 : i32 to index
    %143 = memref.load %arg3[%142] : memref<32xi32, #tpu.memory_space<smem>>
    %c2_i32_77 = arith.constant 2 : i32
    %144 = arith.muli %c2_i32_77, %140 : i32
    %c1_i32_78 = arith.constant 1 : i32
    %145 = arith.addi %144, %c1_i32_78 : i32
    %146 = arith.index_cast %145 : i32 to index
    %147 = memref.load %arg3[%146] : memref<32xi32, #tpu.memory_space<smem>>
    %148 = vector.broadcast %143 : i32 to vector<1x128xi32>
    %149 = arith.cmpi sge, %0, %148 : vector<1x128xi32>
    %150 = vector.broadcast %147 : i32 to vector<1x128xi32>
    %151 = arith.cmpi slt, %0, %150 : vector<1x128xi32>
    %152 = arith.andi %149, %151 : vector<1x128xi1>
    %c0_79 = arith.constant 0 : index
    %c0_80 = arith.constant 0 : index
    %c0_81 = arith.constant 0 : index
    %c0_82 = arith.constant 0 : index
    %153 = vector.load %arg16[%c0_79, %c0_80, %c0_81, %c0_82] : memref<1x1x4x128xf32, #tpu.memory_space<vmem>>, vector<1x1x4x128xf32>
    %154 = vector.shape_cast %153 : vector<1x1x4x128xf32> to vector<4x128xf32>
    %c0_83 = arith.constant 0 : index
    %c0_84 = arith.constant 0 : index
    %c0_85 = arith.constant 0 : index
    %c0_86 = arith.constant 0 : index
    %155 = vector.load %arg17[%c0_83, %c0_84, %c0_85, %c0_86] : memref<1x1x4x128xf32, #tpu.memory_space<vmem>>, vector<1x1x4x128xf32>
    %156 = vector.shape_cast %155 : vector<1x1x4x128xf32> to vector<4x128xf32>
    %157 = tpu.concatenate %154, %156 in 0 : vector<4x128xf32>, vector<4x128xf32> -> vector<8x128xf32>
    %cst_87 = arith.constant 0.000000e+00 : f32
    %158 = vector.shape_cast %152 : vector<1x128xi1> to vector<1x128xi1>
    %159 = vector.broadcast %158 : vector<1x128xi1> to vector<8x128xi1>
    %160 = vector.broadcast %cst_87 : f32 to vector<8x128xf32>
    %161 = arith.select %159, %157, %160 : vector<8x128xi1>, vector<8x128xf32>
    %c8_i32_88 = arith.constant 8 : i32
    %162 = arith.muli %arg0, %c8_i32_88 : i32
    %c7_i32 = arith.constant 7 : i32
    %163 = arith.addi %162, %c7_i32 : i32
    %c2_i32_89 = arith.constant 2 : i32
    %164 = arith.muli %c2_i32_89, %163 : i32
    %165 = arith.index_cast %164 : i32 to index
    %166 = memref.load %arg3[%165] : memref<32xi32, #tpu.memory_space<smem>>
    %c2_i32_90 = arith.constant 2 : i32
    %167 = arith.muli %c2_i32_90, %163 : i32
    %c1_i32_91 = arith.constant 1 : i32
    %168 = arith.addi %167, %c1_i32_91 : i32
    %169 = arith.index_cast %168 : i32 to index
    %170 = memref.load %arg3[%169] : memref<32xi32, #tpu.memory_space<smem>>
    %171 = vector.broadcast %166 : i32 to vector<1x128xi32>
    %172 = arith.cmpi sge, %0, %171 : vector<1x128xi32>
    %173 = vector.broadcast %170 : i32 to vector<1x128xi32>
    %174 = arith.cmpi slt, %0, %173 : vector<1x128xi32>
    %175 = arith.andi %172, %174 : vector<1x128xi1>
    %c0_92 = arith.constant 0 : index
    %c0_93 = arith.constant 0 : index
    %c0_94 = arith.constant 0 : index
    %c0_95 = arith.constant 0 : index
    %176 = vector.load %arg18[%c0_92, %c0_93, %c0_94, %c0_95] : memref<1x1x4x128xf32, #tpu.memory_space<vmem>>, vector<1x1x4x128xf32>
    %177 = vector.shape_cast %176 : vector<1x1x4x128xf32> to vector<4x128xf32>
    %c0_96 = arith.constant 0 : index
    %c0_97 = arith.constant 0 : index
    %c0_98 = arith.constant 0 : index
    %c0_99 = arith.constant 0 : index
    %178 = vector.load %arg19[%c0_96, %c0_97, %c0_98, %c0_99] : memref<1x1x4x128xf32, #tpu.memory_space<vmem>>, vector<1x1x4x128xf32>
    %179 = vector.shape_cast %178 : vector<1x1x4x128xf32> to vector<4x128xf32>
    %180 = tpu.concatenate %177, %179 in 0 : vector<4x128xf32>, vector<4x128xf32> -> vector<8x128xf32>
    %cst_100 = arith.constant 0.000000e+00 : f32
    %181 = vector.shape_cast %175 : vector<1x128xi1> to vector<1x128xi1>
    %182 = vector.broadcast %181 : vector<1x128xi1> to vector<8x128xi1>
    %183 = vector.broadcast %cst_100 : f32 to vector<8x128xf32>
    %184 = arith.select %182, %180, %183 : vector<8x128xi1>, vector<8x128xf32>
    %185 = tpu.concatenate %23, %46, %69, %92, %115, %138, %161, %184 in 0 : vector<8x128xf32>, vector<8x128xf32>, vector<8x128xf32>, vector<8x128xf32>, vector<8x128xf32>, vector<8x128xf32>, vector<8x128xf32>, vector<8x128xf32> -> vector<64x128xf32>
    %c0_101 = arith.constant 0 : index
    %c0_102 = arith.constant 0 : index
    %186 = vector.load %arg20[%c0_101, %c0_102] : memref<64x128xf32, #tpu.memory_space<vmem>>, vector<64x128xf32>
    tpu.vector_store %arg20[%c0_101, %c0_102], %185 {strides = array<i32>} : memref<64x128xf32, #tpu.memory_space<vmem>>, vector<64x128xf32>,
    return
  }
  func.func @transform_0(%arg0: i32, %arg1: memref<16xi32, #tpu.memory_space<smem>>, %arg2: memref<32xi32, #tpu.memory_space<smem>>, %arg3: memref<32xi32, #tpu.memory_space<smem>>) -> (i32, i32, i32, i32) {
    %c8_i32 = arith.constant 8 : i32
    %0 = arith.muli %arg0, %c8_i32 : i32
    %c0_i32 = arith.constant 0 : i32
    %1 = arith.addi %0, %c0_i32 : i32
    %2 = arith.index_cast %1 : i32 to index
    %3 = memref.load %arg1[%2] : memref<16xi32, #tpu.memory_space<smem>>
    %c2_i32 = arith.constant 2 : i32
    %4 = arith.muli %c2_i32, %1 : i32
    %c0_i32_0 = arith.constant 0 : i32
    %5 = arith.addi %4, %c0_i32_0 : i32
    %6 = arith.index_cast %5 : i32 to index
    %7 = memref.load %arg2[%6] : memref<32xi32, #tpu.memory_space<smem>>
    %c0_i32_1 = arith.constant 0 : i32
    %c0_i32_2 = arith.constant 0 : i32
    %c0_i32_3 = arith.constant 0 : i32
    return %3, %7, %c0_i32_1, %c0_i32_2 : i32, i32, i32, i32
  }
  func.func @transform_1(%arg0: i32, %arg1: memref<16xi32, #tpu.memory_space<smem>>, %arg2: memref<32xi32, #tpu.memory_space<smem>>, %arg3: memref<32xi32, #tpu.memory_space<smem>>) -> (i32, i32, i32, i32) {
    %c8_i32 = arith.constant 8 : i32
    %0 = arith.muli %arg0, %c8_i32 : i32
    %c0_i32 = arith.constant 0 : i32
    %1 = arith.addi %0, %c0_i32 : i32
    %2 = arith.index_cast %1 : i32 to index
    %3 = memref.load %arg1[%2] : memref<16xi32, #tpu.memory_space<smem>>
    %c2_i32 = arith.constant 2 : i32
    %4 = arith.muli %c2_i32, %1 : i32
    %c1_i32 = arith.constant 1 : i32
    %5 = arith.addi %4, %c1_i32 : i32
    %6 = arith.index_cast %5 : i32 to index
    %7 = memref.load %arg2[%6] : memref<32xi32, #tpu.memory_space<smem>>
    %c0_i32_0 = arith.constant 0 : i32
    %c0_i32_1 = arith.constant 0 : i32
    %c0_i32_2 = arith.constant 0 : i32
    return %3, %7, %c0_i32_0, %c0_i32_1 : i32, i32, i32, i32
  }
  func.func @transform_2(%arg0: i32, %arg1: memref<16xi32, #tpu.memory_space<smem>>, %arg2: memref<32xi32, #tpu.memory_space<smem>>, %arg3: memref<32xi32, #tpu.memory_space<smem>>) -> (i32, i32, i32, i32) {
    %c8_i32 = arith.constant 8 : i32
    %0 = arith.muli %arg0, %c8_i32 : i32
    %c1_i32 = arith.constant 1 : i32
    %1 = arith.addi %0, %c1_i32 : i32
    %2 = arith.index_cast %1 : i32 to index
    %3 = memref.load %arg1[%2] : memref<16xi32, #tpu.memory_space<smem>>
    %c2_i32 = arith.constant 2 : i32
    %4 = arith.muli %c2_i32, %1 : i32
    %c0_i32 = arith.constant 0 : i32
    %5 = arith.addi %4, %c0_i32 : i32
    %6 = arith.index_cast %5 : i32 to index
    %7 = memref.load %arg2[%6] : memref<32xi32, #tpu.memory_space<smem>>
    %c0_i32_0 = arith.constant 0 : i32
    %c0_i32_1 = arith.constant 0 : i32
    %c0_i32_2 = arith.constant 0 : i32
    return %3, %7, %c0_i32_0, %c0_i32_1 : i32, i32, i32, i32
  }
  func.func @transform_3(%arg0: i32, %arg1: memref<16xi32, #tpu.memory_space<smem>>, %arg2: memref<32xi32, #tpu.memory_space<smem>>, %arg3: memref<32xi32, #tpu.memory_space<smem>>) -> (i32, i32, i32, i32) {
    %c8_i32 = arith.constant 8 : i32
    %0 = arith.muli %arg0, %c8_i32 : i32
    %c1_i32 = arith.constant 1 : i32
    %1 = arith.addi %0, %c1_i32 : i32
    %2 = arith.index_cast %1 : i32 to index
    %3 = memref.load %arg1[%2] : memref<16xi32, #tpu.memory_space<smem>>
    %c2_i32 = arith.constant 2 : i32
    %4 = arith.muli %c2_i32, %1 : i32
    %c1_i32_0 = arith.constant 1 : i32
    %5 = arith.addi %4, %c1_i32_0 : i32
    %6 = arith.index_cast %5 : i32 to index
    %7 = memref.load %arg2[%6] : memref<32xi32, #tpu.memory_space<smem>>
    %c0_i32 = arith.constant 0 : i32
    %c0_i32_1 = arith.constant 0 : i32
    %c0_i32_2 = arith.constant 0 : i32
    return %3, %7, %c0_i32, %c0_i32_1 : i32, i32, i32, i32
  }
  func.func @transform_4(%arg0: i32, %arg1: memref<16xi32, #tpu.memory_space<smem>>, %arg2: memref<32xi32, #tpu.memory_space<smem>>, %arg3: memref<32xi32, #tpu.memory_space<smem>>) -> (i32, i32, i32, i32) {
    %c8_i32 = arith.constant 8 : i32
    %0 = arith.muli %arg0, %c8_i32 : i32
    %c2_i32 = arith.constant 2 : i32
    %1 = arith.addi %0, %c2_i32 : i32
    %2 = arith.index_cast %1 : i32 to index
    %3 = memref.load %arg1[%2] : memref<16xi32, #tpu.memory_space<smem>>
    %c2_i32_0 = arith.constant 2 : i32
    %4 = arith.muli %c2_i32_0, %1 : i32
    %c0_i32 = arith.constant 0 : i32
    %5 = arith.addi %4, %c0_i32 : i32
    %6 = arith.index_cast %5 : i32 to index
    %7 = memref.load %arg2[%6] : memref<32xi32, #tpu.memory_space<smem>>
    %c0_i32_1 = arith.constant 0 : i32
    %c0_i32_2 = arith.constant 0 : i32
    %c0_i32_3 = arith.constant 0 : i32
    return %3, %7, %c0_i32_1, %c0_i32_2 : i32, i32, i32, i32
  }
  func.func @transform_5(%arg0: i32, %arg1: memref<16xi32, #tpu.memory_space<smem>>, %arg2: memref<32xi32, #tpu.memory_space<smem>>, %arg3: memref<32xi32, #tpu.memory_space<smem>>) -> (i32, i32, i32, i32) {
    %c8_i32 = arith.constant 8 : i32
    %0 = arith.muli %arg0, %c8_i32 : i32
    %c2_i32 = arith.constant 2 : i32
    %1 = arith.addi %0, %c2_i32 : i32
    %2 = arith.index_cast %1 : i32 to index
    %3 = memref.load %arg1[%2] : memref<16xi32, #tpu.memory_space<smem>>
    %c2_i32_0 = arith.constant 2 : i32
    %4 = arith.muli %c2_i32_0, %1 : i32
    %c1_i32 = arith.constant 1 : i32
    %5 = arith.addi %4, %c1_i32 : i32
    %6 = arith.index_cast %5 : i32 to index
    %7 = memref.load %arg2[%6] : memref<32xi32, #tpu.memory_space<smem>>
    %c0_i32 = arith.constant 0 : i32
    %c0_i32_1 = arith.constant 0 : i32
    %c0_i32_2 = arith.constant 0 : i32
    return %3, %7, %c0_i32, %c0_i32_1 : i32, i32, i32, i32
  }
  func.func @transform_6(%arg0: i32, %arg1: memref<16xi32, #tpu.memory_space<smem>>, %arg2: memref<32xi32, #tpu.memory_space<smem>>, %arg3: memref<32xi32, #tpu.memory_space<smem>>) -> (i32, i32, i32, i32) {
    %c8_i32 = arith.constant 8 : i32
    %0 = arith.muli %arg0, %c8_i32 : i32
    %c3_i32 = arith.constant 3 : i32
    %1 = arith.addi %0, %c3_i32 : i32
    %2 = arith.index_cast %1 : i32 to index
    %3 = memref.load %arg1[%2] : memref<16xi32, #tpu.memory_space<smem>>
    %c2_i32 = arith.constant 2 : i32
    %4 = arith.muli %c2_i32, %1 : i32
    %c0_i32 = arith.constant 0 : i32
    %5 = arith.addi %4, %c0_i32 : i32
    %6 = arith.index_cast %5 : i32 to index
    %7 = memref.load %arg2[%6] : memref<32xi32, #tpu.memory_space<smem>>
    %c0_i32_0 = arith.constant 0 : i32
    %c0_i32_1 = arith.constant 0 : i32
    %c0_i32_2 = arith.constant 0 : i32
    return %3, %7, %c0_i32_0, %c0_i32_1 : i32, i32, i32, i32
  }
  func.func @transform_7(%arg0: i32, %arg1: memref<16xi32, #tpu.memory_space<smem>>, %arg2: memref<32xi32, #tpu.memory_space<smem>>, %arg3: memref<32xi32, #tpu.memory_space<smem>>) -> (i32, i32, i32, i32) {
    %c8_i32 = arith.constant 8 : i32
    %0 = arith.muli %arg0, %c8_i32 : i32
    %c3_i32 = arith.constant 3 : i32
    %1 = arith.addi %0, %c3_i32 : i32
    %2 = arith.index_cast %1 : i32 to index
    %3 = memref.load %arg1[%2] : memref<16xi32, #tpu.memory_space<smem>>
    %c2_i32 = arith.constant 2 : i32
    %4 = arith.muli %c2_i32, %1 : i32
    %c1_i32 = arith.constant 1 : i32
    %5 = arith.addi %4, %c1_i32 : i32
    %6 = arith.index_cast %5 : i32 to index
    %7 = memref.load %arg2[%6] : memref<32xi32, #tpu.memory_space<smem>>
    %c0_i32 = arith.constant 0 : i32
    %c0_i32_0 = arith.constant 0 : i32
    %c0_i32_1 = arith.constant 0 : i32
    return %3, %7, %c0_i32, %c0_i32_0 : i32, i32, i32, i32
  }
  func.func @transform_8(%arg0: i32, %arg1: memref<16xi32, #tpu.memory_space<smem>>, %arg2: memref<32xi32, #tpu.memory_space<smem>>, %arg3: memref<32xi32, #tpu.memory_space<smem>>) -> (i32, i32, i32, i32) {
    %c8_i32 = arith.constant 8 : i32
    %0 = arith.muli %arg0, %c8_i32 : i32
    %c4_i32 = arith.constant 4 : i32
    %1 = arith.addi %0, %c4_i32 : i32
    %2 = arith.index_cast %1 : i32 to index
    %3 = memref.load %arg1[%2] : memref<16xi32, #tpu.memory_space<smem>>
    %c2_i32 = arith.constant 2 : i32
    %4 = arith.muli %c2_i32, %1 : i32
    %c0_i32 = arith.constant 0 : i32
    %5 = arith.addi %4, %c0_i32 : i32
    %6 = arith.index_cast %5 : i32 to index
    %7 = memref.load %arg2[%6] : memref<32xi32, #tpu.memory_space<smem>>
    %c0_i32_0 = arith.constant 0 : i32
    %c0_i32_1 = arith.constant 0 : i32
    %c0_i32_2 = arith.constant 0 : i32
    return %3, %7, %c0_i32_0, %c0_i32_1 : i32, i32, i32, i32
  }
  func.func @transform_9(%arg0: i32, %arg1: memref<16xi32, #tpu.memory_space<smem>>, %arg2: memref<32xi32, #tpu.memory_space<smem>>, %arg3: memref<32xi32, #tpu.memory_space<smem>>) -> (i32, i32, i32, i32) {
    %c8_i32 = arith.constant 8 : i32
    %0 = arith.muli %arg0, %c8_i32 : i32
    %c4_i32 = arith.constant 4 : i32
    %1 = arith.addi %0, %c4_i32 : i32
    %2 = arith.index_cast %1 : i32 to index
    %3 = memref.load %arg1[%2] : memref<16xi32, #tpu.memory_space<smem>>
    %c2_i32 = arith.constant 2 : i32
    %4 = arith.muli %c2_i32, %1 : i32
    %c1_i32 = arith.constant 1 : i32
    %5 = arith.addi %4, %c1_i32 : i32
    %6 = arith.index_cast %5 : i32 to index
    %7 = memref.load %arg2[%6] : memref<32xi32, #tpu.memory_space<smem>>
    %c0_i32 = arith.constant 0 : i32
    %c0_i32_0 = arith.constant 0 : i32
    %c0_i32_1 = arith.constant 0 : i32
    return %3, %7, %c0_i32, %c0_i32_0 : i32, i32, i32, i32
  }
  func.func @transform_10(%arg0: i32, %arg1: memref<16xi32, #tpu.memory_space<smem>>, %arg2: memref<32xi32, #tpu.memory_space<smem>>, %arg3: memref<32xi32, #tpu.memory_space<smem>>) -> (i32, i32, i32, i32) {
    %c8_i32 = arith.constant 8 : i32
    %0 = arith.muli %arg0, %c8_i32 : i32
    %c5_i32 = arith.constant 5 : i32
    %1 = arith.addi %0, %c5_i32 : i32
    %2 = arith.index_cast %1 : i32 to index
    %3 = memref.load %arg1[%2] : memref<16xi32, #tpu.memory_space<smem>>
    %c2_i32 = arith.constant 2 : i32
    %4 = arith.muli %c2_i32, %1 : i32
    %c0_i32 = arith.constant 0 : i32
    %5 = arith.addi %4, %c0_i32 : i32
    %6 = arith.index_cast %5 : i32 to index
    %7 = memref.load %arg2[%6] : memref<32xi32, #tpu.memory_space<smem>>
    %c0_i32_0 = arith.constant 0 : i32
    %c0_i32_1 = arith.constant 0 : i32
    %c0_i32_2 = arith.constant 0 : i32
    return %3, %7, %c0_i32_0, %c0_i32_1 : i32, i32, i32, i32
  }
  func.func @transform_11(%arg0: i32, %arg1: memref<16xi32, #tpu.memory_space<smem>>, %arg2: memref<32xi32, #tpu.memory_space<smem>>, %arg3: memref<32xi32, #tpu.memory_space<smem>>) -> (i32, i32, i32, i32) {
    %c8_i32 = arith.constant 8 : i32
    %0 = arith.muli %arg0, %c8_i32 : i32
    %c5_i32 = arith.constant 5 : i32
    %1 = arith.addi %0, %c5_i32 : i32
    %2 = arith.index_cast %1 : i32 to index
    %3 = memref.load %arg1[%2] : memref<16xi32, #tpu.memory_space<smem>>
    %c2_i32 = arith.constant 2 : i32
    %4 = arith.muli %c2_i32, %1 : i32
    %c1_i32 = arith.constant 1 : i32
    %5 = arith.addi %4, %c1_i32 : i32
    %6 = arith.index_cast %5 : i32 to index
    %7 = memref.load %arg2[%6] : memref<32xi32, #tpu.memory_space<smem>>
    %c0_i32 = arith.constant 0 : i32
    %c0_i32_0 = arith.constant 0 : i32
    %c0_i32_1 = arith.constant 0 : i32
    return %3, %7, %c0_i32, %c0_i32_0 : i32, i32, i32, i32
  }
  func.func @transform_12(%arg0: i32, %arg1: memref<16xi32, #tpu.memory_space<smem>>, %arg2: memref<32xi32, #tpu.memory_space<smem>>, %arg3: memref<32xi32, #tpu.memory_space<smem>>) -> (i32, i32, i32, i32) {
    %c8_i32 = arith.constant 8 : i32
    %0 = arith.muli %arg0, %c8_i32 : i32
    %c6_i32 = arith.constant 6 : i32
    %1 = arith.addi %0, %c6_i32 : i32
    %2 = arith.index_cast %1 : i32 to index
    %3 = memref.load %arg1[%2] : memref<16xi32, #tpu.memory_space<smem>>
    %c2_i32 = arith.constant 2 : i32
    %4 = arith.muli %c2_i32, %1 : i32
    %c0_i32 = arith.constant 0 : i32
    %5 = arith.addi %4, %c0_i32 : i32
    %6 = arith.index_cast %5 : i32 to index
    %7 = memref.load %arg2[%6] : memref<32xi32, #tpu.memory_space<smem>>
    %c0_i32_0 = arith.constant 0 : i32
    %c0_i32_1 = arith.constant 0 : i32
    %c0_i32_2 = arith.constant 0 : i32
    return %3, %7, %c0_i32_0, %c0_i32_1 : i32, i32, i32, i32
  }
  func.func @transform_13(%arg0: i32, %arg1: memref<16xi32, #tpu.memory_space<smem>>, %arg2: memref<32xi32, #tpu.memory_space<smem>>, %arg3: memref<32xi32, #tpu.memory_space<smem>>) -> (i32, i32, i32, i32) {
    %c8_i32 = arith.constant 8 : i32
    %0 = arith.muli %arg0, %c8_i32 : i32
    %c6_i32 = arith.constant 6 : i32
    %1 = arith.addi %0, %c6_i32 : i32
    %2 = arith.index_cast %1 : i32 to index
    %3 = memref.load %arg1[%2] : memref<16xi32, #tpu.memory_space<smem>>
    %c2_i32 = arith.constant 2 : i32
    %4 = arith.muli %c2_i32, %1 : i32
    %c1_i32 = arith.constant 1 : i32
    %5 = arith.addi %4, %c1_i32 : i32
    %6 = arith.index_cast %5 : i32 to index
    %7 = memref.load %arg2[%6] : memref<32xi32, #tpu.memory_space<smem>>
    %c0_i32 = arith.constant 0 : i32
    %c0_i32_0 = arith.constant 0 : i32
    %c0_i32_1 = arith.constant 0 : i32
    return %3, %7, %c0_i32, %c0_i32_0 : i32, i32, i32, i32
  }
  func.func @transform_14(%arg0: i32, %arg1: memref<16xi32, #tpu.memory_space<smem>>, %arg2: memref<32xi32, #tpu.memory_space<smem>>, %arg3: memref<32xi32, #tpu.memory_space<smem>>) -> (i32, i32, i32, i32) {
    %c8_i32 = arith.constant 8 : i32
    %0 = arith.muli %arg0, %c8_i32 : i32
    %c7_i32 = arith.constant 7 : i32
    %1 = arith.addi %0, %c7_i32 : i32
    %2 = arith.index_cast %1 : i32 to index
    %3 = memref.load %arg1[%2] : memref<16xi32, #tpu.memory_space<smem>>
    %c2_i32 = arith.constant 2 : i32
    %4 = arith.muli %c2_i32, %1 : i32
    %c0_i32 = arith.constant 0 : i32
    %5 = arith.addi %4, %c0_i32 : i32
    %6 = arith.index_cast %5 : i32 to index
    %7 = memref.load %arg2[%6] : memref<32xi32, #tpu.memory_space<smem>>
    %c0_i32_0 = arith.constant 0 : i32
    %c0_i32_1 = arith.constant 0 : i32
    %c0_i32_2 = arith.constant 0 : i32
    return %3, %7, %c0_i32_0, %c0_i32_1 : i32, i32, i32, i32
  }
  func.func @transform_15(%arg0: i32, %arg1: memref<16xi32, #tpu.memory_space<smem>>, %arg2: memref<32xi32, #tpu.memory_space<smem>>, %arg3: memref<32xi32, #tpu.memory_space<smem>>) -> (i32, i32, i32, i32) {
    %c8_i32 = arith.constant 8 : i32
    %0 = arith.muli %arg0, %c8_i32 : i32
    %c7_i32 = arith.constant 7 : i32
    %1 = arith.addi %0, %c7_i32 : i32
    %2 = arith.index_cast %1 : i32 to index
    %3 = memref.load %arg1[%2] : memref<16xi32, #tpu.memory_space<smem>>
    %c2_i32 = arith.constant 2 : i32
    %4 = arith.muli %c2_i32, %1 : i32
    %c1_i32 = arith.constant 1 : i32
    %5 = arith.addi %4, %c1_i32 : i32
    %6 = arith.index_cast %5 : i32 to index
    %7 = memref.load %arg2[%6] : memref<32xi32, #tpu.memory_space<smem>>
    %c0_i32 = arith.constant 0 : i32
    %c0_i32_0 = arith.constant 0 : i32
    %c0_i32_1 = arith.constant 0 : i32
    return %3, %7, %c0_i32, %c0_i32_0 : i32, i32, i32, i32
  }
  func.func @transform_16(%arg0: i32, %arg1: memref<16xi32, #tpu.memory_space<smem>>, %arg2: memref<32xi32, #tpu.memory_space<smem>>, %arg3: memref<32xi32, #tpu.memory_space<smem>>) -> (i32, i32) {
    %c0_i32 = arith.constant 0 : i32
    %c0_i32_0 = arith.constant 0 : i32
    return %arg0, %c0_i32 : i32, i32
  }
}

</mosaic_0001>

<bundles_post_ra>
// kernel: _peak_quality_window.1
= control target key start
LH: loop header
LB: loop body
LE: loop exit
PB: predicated region body
PF: predicated region fallthrough
CT: control target
= control target key end

     0   :  { %s2476_s23 = smov [#allocation4]   ;;  %s2477_s26 = smov [#allocation5]   ;;  %s2813_s0 = inlined_call_operand.vmem [shape: s32[16], index: 0, kind: input, shape index: {}]   ;;  %s2814_s3 = inlined_call_operand.vmem [shape: f32[10,6,4,128], index: 3, kind: input, shape index: {}, may-alias: {3,4,5,6,7,8,9,10,11,12,13,14,15,16,17,18}]   ;;  %s2815_s4 = inlined_call_operand.vmem [shape: f32[10,6,4,128], index: 4, kind: input, shape index: {}, may-alias: {3,4,5,6,7,8,9,10,11,12,13,14,15,16,17,18}]   ;;  %s2816_s5 = inlined_call_operand.vmem [shape: f32[10,6,4,128], index: 5, kind: input, shape index: {}, may-alias: {3,4,5,6,7,8,9,10,11,12,13,14,15,16,17,18}]   ;;  %s2817_s6 = inlined_call_operand.vmem [shape: f32[10,6,4,128], index: 6, kind: input, shape index: {}, may-alias: {3,4,5,6,7,8,9,10,11,12,13,14,15,16,17,18}]   ;;  %s2818_s7 = inlined_call_operand.vmem [shape: f32[10,6,4,128], index: 7, kind: input, shape index: {}, may-alias: {3,4,5,6,7,8,9,10,11,12,13,14,15,16,17,18}]   ;;  %s2819_s8 = inlined_call_operand.vmem [shape: f32[10,6,4,128], index: 8, kind: input, shape index: {}, may-alias: {3,4,5,6,7,8,9,10,11,12,13,14,15,16,17,18}]   ;;  %s2820_s9 = inlined_call_operand.vmem [shape: f32[10,6,4,128], index: 9, kind: input, shape index: {}, may-alias: {3,4,5,6,7,8,9,10,11,12,13,14,15,16,17,18}]   ;;  %s2821_s10 = inlined_call_operand.vmem [shape: f32[10,6,4,128], index: 10, kind: input, shape index: {}, may-alias: {3,4,5,6,7,8,9,10,11,12,13,14,15,16,17,18}]   ;;  %s2822_s11 = inlined_call_operand.vmem [shape: f32[10,6,4,128], index: 11, kind: input, shape index: {}, may-alias: {3,4,5,6,7,8,9,10,11,12,13,14,15,16,17,18}]   ;;  %s2823_s12 = inlined_call_operand.vmem [shape: f32[10,6,4,128], index: 12, kind: input, shape index: {}, may-alias: {3,4,5,6,7,8,9,10,11,12,13,14,15,16,17,18}]   ;;  %s2824_s13 = inlined_call_operand.vmem [shape: f32[10,6,4,128], index: 13, kind: input, shape index: {}, may-alias: {3,4,5,6,7,8,9,10,11,12,13,14,15,16,17,18}]   ;;  %s2825_s14 = inlined_call_operand.vmem [shape: f32[10,6,4,128], index: 14, kind: input, shape index: {}, may-alias: {3,4,5,6,7,8,9,10,11,12,13,14,15,16,17,18}]   ;;  %s2826_s15 = inlined_call_operand.vmem [shape: f32[10,6,4,128], index: 15, kind: input, shape index: {}, may-alias: {3,4,5,6,7,8,9,10,11,12,13,14,15,16,17,18}]   ;;  %s2827_s16 = inlined_call_operand.vmem [shape: f32[10,6,4,128], index: 16, kind: input, shape index: {}, may-alias: {3,4,5,6,7,8,9,10,11,12,13,14,15,16,17,18}]   ;;  %s2828_s17 = inlined_call_operand.vmem [shape: f32[10,6,4,128], index: 17, kind: input, shape index: {}, may-alias: {3,4,5,6,7,8,9,10,11,12,13,14,15,16,17,18}]   ;;  %s2829_s18 = inlined_call_operand.vmem [shape: f32[10,6,4,128], index: 18, kind: input, shape index: {}, may-alias: {3,4,5,6,7,8,9,10,11,12,13,14,15,16,17,18}]   ;;  %s2830_s19 = inlined_call_operand.vmem [shape: f32[128,128], index: 19, kind: output, shape index: {}]   ;;  %s2831_s1 = inlined_call_operand.vmem [shape: s32[32], index: 1, kind: input, shape index: {}]   ;;  %s2832_s2 = inlined_call_operand.vmem [shape: s32[32], index: 2, kind: input, shape index: {}]  }
   0x1   :  { %2834 = sst [smem:[#allocation8_spill]] %s2813_s0  ;;  %s30_s22 = sshll.u32 %s2831_s1, 4  ;;  %s31_s22 = int_to_ptr.vmem [resolvable:$true] %s30_s22 }
   0x2   :  { %2835 = sst [smem:[#allocation9_spill]] %s2814_s3 }
   0x3   :  { %2836 = sst [smem:[#allocation10_spill]] %s2815_s4  ;;  %s2475_s4 = smov [#allocation3]  }
   0x4   :  { %2837 = sst [smem:[#allocation11_spill]] %s2816_s5  ;;  %s35_s5 = sshll.u32 %s2832_s2, 4  ;;  %s36_s5 = int_to_ptr.vmem [resolvable:$true] %s35_s5 }
   0x5   :  { %2838 = sst [smem:[#allocation12_spill]] %s2824_s13 }
   0x6   :  { %2839 = sst [smem:[#allocation13_spill]] %s2825_s14 }
   0x7   :  { %2840 = sst [smem:[#allocation14_spill]] %s2826_s15 }
   0x8   :  { %2841 = sst [smem:[#allocation15_spill]] %s2827_s16 }
   0x9   :  { %2842 = sst [smem:[#allocation16_spill]] %s2828_s17 }
   0xa   :  { %2843 = sst [smem:[#allocation17_spill]] %s2829_s18 }
   0xb   :  { %s2844_s20 = sld [smem:[#allocation8_spill]] }
  0x11   :  { %s25_s15 = sshll.u32 %s2844_s20, 4  ;;  %s26_s15 = int_to_ptr.vmem [resolvable:$true] %s25_s15 }
  0x12   :  { %28 = dma.vmem_to_smem %s26_s15, 16, %s2475_s4, [#allocation2] }
  0x13   :  { %33 = dma.vmem_to_smem %s31_s22, 16, %s2476_s23, [#allocation2] }
  0x14   :  { %38 = dma.vmem_to_smem %s36_s5, 16, %s2477_s26, [#allocation2] }
  0x15   :  { %2469 = dma.done.wait [#allocation2], 48 }
  0x16   :  { %2470 = vsyncadd [#allocation2], 4294967248 }
  0x17   :  { %41 = sfence }
  0x18   :  { %s2587_s27 = smov 0  }
  0x19 LB: > { %2845 = sst [smem:[#allocation7_spill]] %s2473_s27  ;;  %s2117_s1 = sadd.s32 4294967295, %s2473_s27   ;;  %s2473_s27 = sphi %s2587_s27, %s47_s27  }
  0x1a   : > { %p2185_p0 = scmp.ge.s32.totalorder %s2473_s27, 1  ;;  %p1057_p1 = scmp.lt.s32.totalorder %s2473_s27, 3 }
  0x1c   : > { %p1058_p2 = pnand %p2185_p0, %p1057_p1 }
  0x1d   : > { %s2595_s2 = sshll.u32 (!%p1058_p2), %s2117_s1, 3  ;;  %s2597_s15 = sshll.u32 (!%p1058_p2), %s2117_s1, 4 }
  0x1e   : > { %1061 = sbr.rel (%p1058_p2) target bundleno = 148 (0x94), region = 84  ;;  %s1317_s28 = sld [smem:[#allocation3 + %s2595_s2]] (!%p1058_p2) }
  0x1f   : > { %s1335_s29 = sadd.s32 (!%p1058_p2), 1, %s2597_s15  ;;  %s1319_s0 = sld [smem:[#allocation4 + %s2597_s15]] (!%p1058_p2) }
  0x20   : > { %p1617_p3 = scmp.lt.s32.totalorder (!%p1058_p2), %s2595_s2, 15  ;;  %s1333_s30 = sld [smem:[#allocation3 + %s2595_s2]] (!%p1058_p2) }
  0x21   : > { %s1351_s20 = sadd.s32 (!%p1058_p2), 1, %s2595_s2  ;;  %s1336_s21 = sld [smem:[#allocation4 + %s1335_s29]] (!%p1058_p2) }
  0x22   : > { %s2606_s3 = sadd.s32 (!%p1058_p2), 2, %s2597_s15  ;;  %s2610_s4 = sld [smem:[#allocation5 + %s2597_s15]] (!%p1058_p2) }
  0x23   : > { %s1618_s22 = scalar_select %p1617_p3, %s2595_s2, 15  ;;  %v1622_v0 = vlaneseq  ;;  %vm1638_vm2 = vcmask 1043456  }
  0x24   : > { %p1320_p4 = scmp.lt.s32.totalorder %s1317_s28, 9  ;;  %s1627_s27 = sld [smem:[#allocation5 + %s1335_s29]] }
  0x25   : > { %s2235_s24 = sshll.u32 %s1618_s22, 3  ;;  %p1322_p5 = scmp.lt.s32.totalorder %s1319_s0, 5  ;;  %v2622_v1 = vand.u32 127, %v1622_v0 }
  0x26   : > { %s2616_s26 = scalar_lea.vmem %s2830_s19, %s2235_s24  ;;  %s2887_s28 = smov (!%p1320_p4, %s1317_s28), 9 }
  0x27   : > { %s2889_s0 = smov (!%p1322_p5, %s1319_s0), 5  ;;  %s2402_s1 = smul.u32 6, %s2887_s28 }
  0x28   : > { %p1337_p6 = scmp.lt.s32.totalorder %s1333_s30, 9  ;;  %p1339_p7 = scmp.lt.s32.totalorder %s1336_s21, 5  ;;  %v1628_v2 = vstv %s2610_s4 }
  0x29   : > { %s1325_s18 = sadd.s32 %s2402_s1, %s2889_s0  ;;  %s1352_s23 = sld [smem:[#allocation3 + %s1351_s20]]  ;;  %vm2633_vm0 = vcmp.ge.s32.totalorder %v2622_v1, %v1628_v2 }
  0x2a   : > { %s2188_s17 = sshll.u32 %s1325_s18, 2  ;;  %s1354_s22 = sld [smem:[#allocation4 + %s2606_s3]]  ;;  %v1630_v3 = vstv %s1627_s27 }
  0x2b   : > { %s2846_s13 = sld [smem:[#allocation9_spill]]  ;;  %s2891_s30 = smov (!%p1337_p6, %s1333_s30), 9  ;;  %vm2638_vm1 = vcmp.lt.s32.totalorder %v2622_v1, %v1630_v3 }
  0x2c   : > { %s1370_s24 = sld [smem:[#allocation3 + %s1351_s20]]  ;;  %s2893_s21 = smov (!%p1339_p7, %s1336_s21), 5  ;;  %vm1632_vm3 = vmand %vm2633_vm0, %vm2638_vm1 }
  0x2d   : > { %s2403_s28 = smul.u32 6, %s2891_s30  ;;  %s2847_s29 = sadd.s32 1, %s2606_s3 }
  0x2e   : > { %s2627_s5 = sld [smem:[#allocation4 + %s2847_s29]]  ;;  %s2853_s30 = smov %s2847_s29 }
  0x2f   : > { %p1355_p8 = scmp.lt.s32.totalorder %s1352_s23, 9  ;;  %s2630_s0 = sld [smem:[#allocation5 + %s2606_s3]] }
  0x30   : > { %s1342_s18 = sadd.s32 %s2403_s28, %s2893_s21  ;;  %p1357_p9 = scmp.lt.s32.totalorder %s1354_s22, 5 }
  0x31   : > { %s1327_s25 = scalar_lea.vmem %s2846_s13, %s2188_s17  ;;  %s2191_s14 = sshll.u32 %s1342_s18, 2 }
  0x32   : > { %p1374_p10 = scmp.lt.s32.totalorder %s1370_s24, 9  ;;  %s2852_s17 = sld [smem:[#allocation10_spill]]  ;;  %v1633_v6 = vld [vmem:[%s1327_s25] sm:$0xf] }
  0x33   : > { %s1648_s20 = sld [smem:[#allocation5 + %s2853_s30]]  ;;  %s2895_s23 = smov (!%p1355_p8, %s1352_s23), 9 }
  0x34   : > { %s2897_s22 = smov (!%p1357_p9, %s1354_s22), 5  ;;  %s2404_s21 = smul.u32 6, %s2895_s23 }
  0x35   : > { %p1376_p11 = scmp.lt.s32.totalorder %s2627_s5, 5  ;;  %s2899_s24 = smov (!%p1374_p10, %s1370_s24), 9  ;;  %v1649_v11 = vstv %s2630_s0 }
  0x36   : > { %s1360_s3 = sadd.s32 %s2404_s21, %s2897_s22  ;;  %s1389_s4 = sadd.s32 2, %s2595_s2  ;;  %vm2662_vm4 = vcmp.ge.s32.totalorder %v2622_v1, %v1649_v11 }
  0x37   : > { %s2194_s1 = sshll.u32 %s1360_s3, 2  ;;  %s2405_s25 = smul.u32 6, %s2899_s24 }
  0x38   : > { %s1344_s27 = scalar_lea.vmem %s2852_s17, %s2191_s14  ;;  %s2854_s18 = sld [smem:[#allocation11_spill]] }
  0x39   : > { %v1634_v7 = vld [vmem:[%s1344_s27] sm:$0xf]  ;;  %s1390_s13 = sld [smem:[#allocation3 + %s1389_s4]]  ;;  %s2901_s5 = smov (!%p1376_p11, %s2627_s5), 5  ;;  %v1651_v12 = vstv %s1648_s20 }
  0x3a   : > { %v1636_v8 = vrot.slane %v1634_v7, 4  ;;  %s2344_s16 = sadd.s32 4, %s2597_s15  ;;  %s1408_s23 = sld [smem:[#allocation3 + %s1389_s4]]  ;;  %vm2667_vm5 = vcmp.lt.s32.totalorder %v2622_v1, %v1651_v12 }
  0x3b   : > { %s1379_s17 = sadd.s32 %s2405_s25, %s2901_s5  ;;  %s1392_s27 = sld [smem:[#allocation4 + %s2344_s16]]  ;;  %vm1653_vm6 = vmand %vm2662_vm4, %vm2667_vm5 }
  0x3c   : > { %v1639_v9 = vsel %vm1638_vm2, %v1633_v6, %v1636_v8  ;;  %s2197_s30 = sshll.u32 %s1379_s17, 2  ;;  %s1410_s22 = sadd.s32 1, %s2344_s16 }
  0x3d   : > { %v1642_v10 = vsel %vm1632_vm3, %v1639_v9, 0.0  ;;  %s1381_s20 = scalar_lea.vmem %s2817_s6, %s2197_s30  ;;  %s1411_s21 = sld [smem:[#allocation4 + %s1410_s22]] }
  0x3e   : > { %1777 = vst [vmem:[%s2616_s26] sm:$0xff] %v1642_v10  ;;  %s1362_s14 = scalar_lea.vmem %s2854_s18, %s2194_s1  ;;  %v1655_v16 = vld [vmem:[%s1381_s20] sm:$0xf]  ;;  %s1665_s5 = sld [smem:[#allocation5 + %s2344_s16]] }
  0x3f   : > { %v1654_v15 = vld [vmem:[%s1362_s14] sm:$0xf]  ;;  %p1393_p12 = scmp.lt.s32.totalorder %s1390_s13, 9  ;;  %v1657_v17 = vrot.slane %v1655_v16, 4  ;;  %s1667_s3 = sld [smem:[#allocation5 + %s1410_s22]] }
  0x40   : > { %s1427_s4 = sadd.s32 3, %s2595_s2  ;;  %p1412_p0 = scmp.lt.s32.totalorder %s1408_s23, 9 }
  0x41   : > { %s2903_s13 = smov (!%p1393_p12, %s1390_s13), 9  ;;  %v1659_v18 = vsel %vm1638_vm2, %v1654_v15, %v1657_v17  ;;  %p1395_p13 = scmp.lt.s32.totalorder %s1392_s27, 5 }
  0x42   : > { %v1662_v19 = vsel %vm1653_vm6, %v1659_v18, 0.0  ;;  %s2406_s1 = smul.u32 6, %s2903_s13  ;;  %s1428_s25 = sld [smem:[#allocation3 + %s1427_s4]] }
  0x43   : > { %1778 = vst [vmem:[%s2616_s26 + $0x8] sm:$0xff] %v1662_v19  ;;  %s2905_s27 = smov (!%p1395_p13, %s1392_s27), 5  ;;  %s2907_s23 = smov (!%p1412_p0, %s1408_s23), 9 }
  0x44   : > { %s1398_s28 = sadd.s32 %s2406_s1, %s2905_s27  ;;  %p1414_p1 = scmp.lt.s32.totalorder %s1411_s21, 5  ;;  %v1668_v20 = vstv %s1665_s5 }
  0x45   : > { %s2200_s29 = sshll.u32 %s1398_s28, 2  ;;  %s2407_s18 = smul.u32 6, %s2907_s23  ;;  %v1670_v21 = vstv %s1667_s3  ;;  %vm2686_vm7 = vcmp.ge.s32.totalorder %v2622_v1, %v1668_v20 }
  0x46   : > { %s1400_s17 = scalar_lea.vmem %s2818_s7, %s2200_s29  ;;  %s2348_s30 = sadd.s32 6, %s2597_s15  ;;  %vm2691_vm8 = vcmp.lt.s32.totalorder %v2622_v1, %v1670_v21 }
  0x47   : > { %s2909_s21 = smov (!%p1414_p1, %s1411_s21), 5  ;;  %s1430_s22 = sld [smem:[#allocation4 + %s2348_s30]]  ;;  %v1673_v24 = vld [vmem:[%s1400_s17] sm:$0xf]  ;;  %vm1672_vm9 = vmand %vm2686_vm7, %vm2691_vm8 }
  0x48   : > { %p1431_p2 = scmp.lt.s32.totalorder %s1428_s25, 9  ;;  %s1417_s13 = sadd.s32 %s2407_s18, %s2909_s21 }
  0x49   : > { %s1446_s24 = sld [smem:[#allocation3 + %s1427_s4]]  ;;  %s2203_s0 = sshll.u32 %s1417_s13, 2 }
  0x4a   : > { %s1448_s23 = sadd.s32 1, %s2348_s30  ;;  %s1419_s5 = scalar_lea.vmem %s2819_s8, %s2203_s0 }
  0x4b   : > { %s1449_s3 = sld [smem:[#allocation4 + %s1448_s23]]  ;;  %v1674_v25 = vld [vmem:[%s1419_s5] sm:$0xf]  ;;  %s2911_s25 = smov (!%p1431_p2, %s1428_s25), 9 }
  0x4c   : > { %v1676_v26 = vrot.slane %v1674_v25, 4  ;;  %s1684_s21 = sld [smem:[#allocation5 + %s2348_s30]]  ;;  %s1465_s4 = sadd.s32 4, %s2595_s2 }
  0x4d   : > { %p1433_p3 = scmp.lt.s32.totalorder %s1430_s22, 5  ;;  %s2408_s1 = smul.u32 6, %s2911_s25 }
  0x4e   : > { %v1678_v27 = vsel %vm1638_vm2, %v1673_v24, %v1676_v26  ;;  %s1686_s28 = sld [smem:[#allocation5 + %s1448_s23]]  ;;  %s2352_s25 = sadd.s32 8, %s2597_s15 }
  0x4f   : > { %p1450_p4 = scmp.lt.s32.totalorder %s1446_s24, 9  ;;  %v1681_v28 = vsel %vm1672_vm9, %v1678_v27, 0.0  ;;  %s2913_s22 = smov (!%p1433_p3, %s1430_s22), 5 }
  0x50   : > { %1779 = vst [vmem:[%s2616_s26 + $0x10] sm:$0xff] %v1681_v28  ;;  %s1436_s29 = sadd.s32 %s2408_s1, %s2913_s22  ;;  %s1466_s13 = sld [smem:[#allocation3 + %s1465_s4]] }
  0x51   : > { %s2915_s24 = smov (!%p1450_p4, %s1446_s24), 9  ;;  %p1452_p5 = scmp.lt.s32.totalorder %s1449_s3, 5 }
  0x52   : > { %s2206_s18 = sshll.u32 %s1436_s29, 2  ;;  %s2409_s14 = smul.u32 6, %s2915_s24  ;;  %v1687_v29 = vstv %s1684_s21 }
  0x53   : > { %s1438_s30 = scalar_lea.vmem %s2820_s9, %s2206_s18  ;;  %s2917_s3 = smov (!%p1452_p5, %s1449_s3), 5  ;;  %vm2710_vm10 = vcmp.ge.s32.totalorder %v2622_v1, %v1687_v29 }
  0x54   : > { %v1689_v30 = vstv %s1686_s28  ;;  %s1484_s0 = sld [smem:[#allocation3 + %s1465_s4]]  ;;  %s1455_s23 = sadd.s32 %s2409_s14, %s2917_s3  ;;  %v1692_v33 = vld [vmem:[%s1438_s30] sm:$0xf] }
  0x55   : > { %s1468_s27 = sld [smem:[#allocation4 + %s2352_s25]]  ;;  %s2209_s20 = sshll.u32 %s1455_s23, 2  ;;  %vm2715_vm11 = vcmp.lt.s32.totalorder %v2622_v1, %v1689_v30 }
  0x56   : > { %s1486_s22 = sadd.s32 1, %s2352_s25  ;;  %s1457_s21 = scalar_lea.vmem %s2821_s10, %s2209_s20  ;;  %vm1691_vm12 = vmand %vm2710_vm10, %vm2715_vm11 }
  0x57   : > { %s1487_s4 = sld [smem:[#allocation4 + %s1486_s22]]  ;;  %v1693_v34 = vld [vmem:[%s1457_s21] sm:$0xf]  ;;  %p1469_p6 = scmp.lt.s32.totalorder %s1466_s13, 9 }
  0x58   : > { %s1703_s3 = sld [smem:[#allocation5 + %s2352_s25]]  ;;  %v1695_v35 = vrot.slane %v1693_v34, 4  ;;  %s1503_s28 = sadd.s32 5, %s2595_s2 }
  0x59   : > { %s1705_s1 = sld [smem:[#allocation5 + %s1486_s22]]  ;;  %s2919_s13 = smov (!%p1469_p6, %s1466_s13), 9 }
  0x5a   : > { %v1697_v36 = vsel %vm1638_vm2, %v1692_v33, %v1695_v35  ;;  %p1488_p8 = scmp.lt.s32.totalorder %s1484_s0, 9  ;;  %s2410_s29 = smul.u32 6, %s2919_s13 }
  0x5b   : > { %p1471_p7 = scmp.lt.s32.totalorder %s1468_s27, 5  ;;  %v1700_v37 = vsel %vm1691_vm12, %v1697_v36, 0.0  ;;  %s1504_s18 = sld [smem:[#allocation3 + %s1503_s28]] }
  0x5c   : > { %1780 = vst [vmem:[%s2616_s26 + $0x18] sm:$0xff] %v1700_v37  ;;  %s2923_s0 = smov (!%p1488_p8, %s1484_s0), 9  ;;  %s2356_s20 = sadd.s32 10, %s2597_s15 }
  0x5d   : > { %s2921_s27 = smov (!%p1471_p7, %s1468_s27), 5  ;;  %p1490_p9 = scmp.lt.s32.totalorder %s1487_s4, 5 }
  0x5e   : > { %s1474_s14 = sadd.s32 %s2410_s29, %s2921_s27  ;;  %s2411_s17 = smul.u32 6, %s2923_s0  ;;  %v1706_v38 = vstv %s1703_s3 }
  0x5f   : > { %s2212_s16 = sshll.u32 %s1474_s14, 2  ;;  %s2925_s4 = smov (!%p1490_p9, %s1487_s4), 5  ;;  %v1708_v39 = vstv %s1705_s1  ;;  %vm2734_vm13 = vcmp.ge.s32.totalorder %v2622_v1, %v1706_v38 }
  0x60   : > { %s1476_s23 = scalar_lea.vmem %s2822_s11, %s2212_s16  ;;  %s1506_s22 = sld [smem:[#allocation4 + %s2356_s20]]  ;;  %vm2739_vm14 = vcmp.lt.s32.totalorder %v2622_v1, %v1708_v39 }
  0x61   : > { %p1507_p10 = scmp.lt.s32.totalorder %s1504_s18, 9  ;;  %s1493_s13 = sadd.s32 %s2411_s17, %s2925_s4  ;;  %v1711_v42 = vld [vmem:[%s1476_s23] sm:$0xf]  ;;  %vm1710_vm15 = vmand %vm2734_vm13, %vm2739_vm14 }
  0x62   : > { %s1522_s24 = sld [smem:[#allocation3 + %s1503_s28]]  ;;  %s2215_s5 = sshll.u32 %s1493_s13, 2 }
  0x63   : > { %s1524_s0 = sadd.s32 1, %s2356_s20  ;;  %s1495_s3 = scalar_lea.vmem %s2823_s12, %s2215_s5 }
  0x64   : > { %s1525_s1 = sld [smem:[#allocation4 + %s1524_s0]]  ;;  %v1712_v43 = vld [vmem:[%s1495_s3] sm:$0xf]  ;;  %s2927_s18 = smov (!%p1507_p10, %s1504_s18), 9 }
  0x65   : > { %v1714_v44 = vrot.slane %v1712_v43, 4  ;;  %s1722_s4 = sld [smem:[#allocation5 + %s2356_s20]]  ;;  %s1541_s28 = sadd.s32 6, %s2595_s2 }
  0x66   : > { %p1509_p11 = scmp.lt.s32.totalorder %s1506_s22, 5  ;;  %s2412_s29 = smul.u32 6, %s2927_s18 }
  0x67   : > { %v1716_v45 = vsel %vm1638_vm2, %v1711_v42, %v1714_v44  ;;  %s1724_s14 = sld [smem:[#allocation5 + %s1524_s0]]  ;;  %s2360_s18 = sadd.s32 12, %s2597_s15 }
  0x68   : > { %p1526_p12 = scmp.lt.s32.totalorder %s1522_s24, 9  ;;  %v1719_v46 = vsel %vm1710_vm15, %v1716_v45, 0.0  ;;  %s2929_s22 = smov (!%p1509_p11, %s1506_s22), 5 }
  0x69   : > { %1781 = vst [vmem:[%s2616_s26 + $0x20] sm:$0xff] %v1719_v46  ;;  %s1512_s16 = sadd.s32 %s2412_s29, %s2929_s22  ;;  %s2871_s13 = sld [smem:[#allocation12_spill]] }
  0x6a   : > { %s2931_s24 = smov (!%p1526_p12, %s1522_s24), 9  ;;  %p1528_p13 = scmp.lt.s32.totalorder %s1525_s1, 5 }
  0x6b   : > { %s2218_s17 = sshll.u32 %s1512_s16, 2  ;;  %s2413_s30 = smul.u32 6, %s2931_s24  ;;  %v1725_v47 = vstv %s1722_s4 }
  0x6c   : > { %s1542_s5 = sld [smem:[#allocation3 + %s1541_s28]]  ;;  %s2933_s1 = smov (!%p1528_p13, %s1525_s1), 5  ;;  %vm2758_vm0 = vcmp.ge.s32.totalorder %v2622_v1, %v1725_v47 }
  0x6d   : > { %v1727_v48 = vstv %s1724_s14  ;;  %s1560_s27 = sld [smem:[#allocation3 + %s1541_s28]]  ;;  %s1531_s0 = sadd.s32 %s2413_s30, %s2933_s1 }
  0x6e   : > { %s1544_s21 = sld [smem:[#allocation4 + %s2360_s18]]  ;;  %s2221_s3 = sshll.u32 %s1531_s0, 2  ;;  %vm2763_vm1 = vcmp.lt.s32.totalorder %v2622_v1, %v1727_v48 }
  0x6f   : > { %s1514_s20 = scalar_lea.vmem %s2871_s13, %s2218_s17  ;;  %s1562_s22 = sadd.s32 1, %s2360_s18  ;;  %vm1729_vm3 = vmand %vm2758_vm0, %vm2763_vm1 }
  0x70   : > { %s2876_s29 = sld [smem:[#allocation13_spill]]  ;;  %v1730_v51 = vld [vmem:[%s1514_s20] sm:$0xf]  ;;  %s1579_s17 = sadd.s32 7, %s2595_s2 }
  0x71   : > { %s1563_s28 = sld [smem:[#allocation4 + %s1562_s22]] }
  0x72   : > { %p1545_p0 = scmp.lt.s32.totalorder %s1542_s5, 9  ;;  %s1741_s1 = sld [smem:[#allocation5 + %s2360_s18]] }
  0x73   : > { %s1743_s16 = sld [smem:[#allocation5 + %s1562_s22]]  ;;  %p1564_p2 = scmp.lt.s32.totalorder %s1560_s27, 9 }
  0x74   : > { %s2935_s5 = smov (!%p1545_p0, %s1542_s5), 9  ;;  %p1547_p1 = scmp.lt.s32.totalorder %s1544_s21, 5 }
  0x75   : > { %s2414_s30 = smul.u32 6, %s2935_s5  ;;  %s1580_s25 = sld [smem:[#allocation3 + %s1579_s17]] }
  0x76   : > { %s1533_s14 = scalar_lea.vmem %s2876_s29, %s2221_s3  ;;  %s2937_s21 = smov (!%p1547_p1, %s1544_s21), 5 }
  0x77   : > { %v1731_v52 = vld [vmem:[%s1533_s14] sm:$0xf]  ;;  %s2939_s27 = smov (!%p1564_p2, %s1560_s27), 9  ;;  %s1550_s23 = sadd.s32 %s2414_s30, %s2937_s21 }
  0x78   : > { %v1733_v53 = vrot.slane %v1731_v52, 4  ;;  %p1566_p3 = scmp.lt.s32.totalorder %s1563_s28, 5  ;;  %s2224_s13 = sshll.u32 %s1550_s23, 2  ;;  %v1744_v56 = vstv %s1741_s1 }
  0x79   : > { %s2415_s20 = smul.u32 6, %s2939_s27  ;;  %s2877_s3 = sld [smem:[#allocation14_spill]]  ;;  %v1746_v57 = vstv %s1743_s16  ;;  %vm2782_vm4 = vcmp.ge.s32.totalorder %v2622_v1, %v1744_v56 }
  0x7a   : > { %v1735_v54 = vsel %vm1638_vm2, %v1730_v51, %v1733_v53  ;;  %s2364_s22 = sadd.s32 14, %s2597_s15  ;;  %s2941_s28 = smov (!%p1566_p3, %s1563_s28), 5  ;;  %vm2787_vm5 = vcmp.lt.s32.totalorder %v2622_v1, %v1746_v57 }
  0x7b   : > { %v1738_v55 = vsel %vm1729_vm3, %v1735_v54, 0.0  ;;  %s1582_s24 = sld [smem:[#allocation4 + %s2364_s22]]  ;;  %p1583_p4 = scmp.lt.s32.totalorder %s1580_s25, 9  ;;  %vm1748_vm6 = vmand %vm2782_vm4, %vm2787_vm5 }
  0x7c   : > { %1782 = vst [vmem:[%s2616_s26 + $0x28] sm:$0xff] %v1738_v55  ;;  %s1569_s4 = sadd.s32 %s2415_s20, %s2941_s28  ;;  %s1598_s5 = sld [smem:[#allocation3 + %s1579_s17]] }
  0x7d   : > { %s2227_s29 = sshll.u32 %s1569_s4, 2  ;;  %s1600_s27 = sadd.s32 1, %s2364_s22 }
  0x7e   : > { %s2882_s14 = sld [smem:[#allocation15_spill]]  ;;  %s2943_s25 = smov (!%p1583_p4, %s1580_s25), 9 }
  0x7f   : > { %s1552_s2 = scalar_lea.vmem %s2877_s3, %s2224_s13  ;;  %s1601_s16 = sld [smem:[#allocation4 + %s1600_s27]] }
  0x80   : > { %v1749_v60 = vld [vmem:[%s1552_s2] sm:$0xf]  ;;  %s1760_s28 = sld [smem:[#allocation5 + %s2364_s22]]  ;;  %s2416_s17 = smul.u32 6, %s2943_s25 }
  0x81   : > { %p1585_p5 = scmp.lt.s32.totalorder %s1582_s24, 5  ;;  %s1762_s30 = sld [smem:[#allocation5 + %s1600_s27]] }
  0x82   : > { %p1602_p6 = scmp.lt.s32.totalorder %s1598_s5, 9  ;;  %s2883_s3 = sld [smem:[#allocation16_spill]] }
  0x83   : > { %s2945_s24 = smov (!%p1585_p5, %s1582_s24), 5 }
  0x84   : > { %s1571_s1 = scalar_lea.vmem %s2882_s14, %s2227_s29  ;;  %s2947_s5 = smov (!%p1602_p6, %s1598_s5), 9 }
  0x85   : > { %v1750_v61 = vld [vmem:[%s1571_s1] sm:$0xf]  ;;  %s1588_s23 = sadd.s32 %s2416_s17, %s2945_s24  ;;  %p1604_p7 = scmp.lt.s32.totalorder %s1601_s16, 5 }
  0x86   : > { %v1752_v62 = vrot.slane %v1750_v61, 4  ;;  %s2417_s13 = smul.u32 6, %s2947_s5  ;;  %s2230_s20 = sshll.u32 %s1588_s23, 2  ;;  %v1763_v2 = vstv %s1760_s28 }
  0x87   : > { %s2949_s16 = smov (!%p1604_p7, %s1601_s16), 5  ;;  %v1765_v3 = vstv %s1762_s30  ;;  %vm1764_vm7 = vcmp.ge.s32.totalorder %v2622_v1, %v1763_v2  ;;  %s2884_s24 = sld [smem:[#allocation17_spill]] }
  0x88   : > { %v1754_v63 = vsel %vm1638_vm2, %v1749_v60, %v1752_v62  ;;  %s1590_s25 = scalar_lea.vmem %s2883_s3, %s2230_s20  ;;  %s1607_s2 = sadd.s32 %s2417_s13, %s2949_s16  ;;  %vm1766_vm8 = vcmp.lt.s32.totalorder %v2622_v1, %v1765_v3 }
  0x89   : > { %v1757_v0 = vsel %vm1748_vm6, %v1754_v63, 0.0  ;;  %s2233_s22 = sshll.u32 %s1607_s2, 2  ;;  %v1768_v4 = vld [vmem:[%s1590_s25] sm:$0xf]  ;;  %vm1767_vm9 = vmand %vm1764_vm7, %vm1766_vm8 }
  0x8a   : > { %1783 = vst [vmem:[%s2616_s26 + $0x30] sm:$0xff] %v1757_v0 }
  0x8d   : > { %s1609_s27 = scalar_lea.vmem %s2884_s24, %s2233_s22 }
  0x8e   : > { %v1769_v5 = vld [vmem:[%s1609_s27] sm:$0xf] }
  0x8f   : > { %v1771_v6 = vrot.slane %v1769_v5, 4 }
  0x91   : > { %v1773_v7 = vsel %vm1638_vm2, %v1768_v4, %v1771_v6 }
  0x92   : > { %v1776_v8 = vsel %vm1767_vm9, %v1773_v7, 0.0 }
  0x93   : > { %1784 = vst [vmem:[%s2616_s26 + $0x38] sm:$0xff] %v1776_v8 }
  0x94 PF: > { %s2885_s5 = sld [smem:[#allocation7_spill]] }
  0x9a   : > { %s47_s27 = sadd.s32 1, %s2885_s5  }
  0x9b   : > { %p44_p8 = scmp.ge.s32.totalorder %s47_s27, 4  }
  0x9d   :  { %46 = sbr.rel (!%p44_p8) target bundleno = 25 (0x19), region = 159 }

</bundles_post_ra>
